<compile_context>
chip_gen: v7x
topology: tpu7x:2x2x1
jax: 0.10.0
libtpu: 0.0.40
codegen_flags: <defaults>
</compile_context>

<pallas_src>
import jax
import jax.numpy as jnp
from jax.experimental import pallas as pl
from jax.experimental.pallas import tpu as pltpu


def _nmf_forward_kernel(u_ref, v_ref, u_out_ref, v_out_ref):
    # forward() == (U, V): a plain whole-block copy, fully inside VMEM.
    u_out_ref[...] = u_ref[...]
    v_out_ref[...] = v_ref[...]


def nmf_forward(U: jax.Array, V: jax.Array):
    """Pallas equivalent of NMF.forward(): returns (U, V).

    Single grid-less pallas_call; each tensor is one whole-array VMEM block
    (both are a few KiB), so there is exactly one HBM->VMEM->HBM round trip
    per tensor and zero per-step pipeline overhead.
    """
    return pl.pallas_call(
        _nmf_forward_kernel,
        out_shape=(
            jax.ShapeDtypeStruct(U.shape, U.dtype),
            jax.ShapeDtypeStruct(V.shape, V.dtype),
        ),
        # Whole-array blocks in VMEM (default memory space); no grid, no tiling.
        in_specs=[
            pl.BlockSpec(U.shape, lambda: (0, 0)),
            pl.BlockSpec(V.shape, lambda: (0, 0)),
        ],
        out_specs=(
            pl.BlockSpec(U.shape, lambda: (0, 0)),
            pl.BlockSpec(V.shape, lambda: (0, 0)),
        ),
    )(U, V)


class NMFPallas:
    """Mirror of the PyTorch NMF module with deterministic init."""

    def __init__(self, n, p, num_components, seed=0):
        print("{0} obs with {1} features".format(n, p))
        key = jax.random.PRNGKey(seed)
        ku, kv = jax.random.split(key)
        # torch.randn equivalent: standard-normal f32 parameters.
        self.U = jax.random.normal(ku, (n, num_components), dtype=jnp.float32)
        self.V = jax.random.normal(kv, (num_components, p), dtype=jnp.float32)

    def params(self):
        # Fastest path (perf-review recommendation #1): no kernel launch at all.
        return self.U, self.V

    def __call__(self):
        # Pallas path, kept for API parity with the kernel requirement.
        return nmf_forward(self.U, self.V)


if __name__ == "__main__":
    # Small shapes: n=16 observations, p=32 features, 8 latent components.
    n, p, num_components = 16, 32, 8
    model = NMFPallas(n, p, num_components, seed=0)

    U_out, V_out = model()
    jax.block_until_ready(U_out)
    jax.block_until_ready(V_out)

    # Sanity checks: forward returns exactly the parameters.
    assert U_out.shape == (n, num_components) and U_out.dtype == jnp.float32
    assert V_out.shape == (num_components, p) and V_out.dtype == jnp.float32
    assert jnp.allclose(U_out, model.U) and jnp.allclose(V_out, model.V)

    # Launch-free path agrees trivially as well.
    U_fast, V_fast = model.params()
    assert jnp.allclose(U_fast, U_out) and jnp.allclose(V_fast, V_out)

    print("KERNEL_OK")
</pallas_src>

<mosaic_0001>
module attributes {stable_mosaic.version = 11 : i64} {
  func.func @_nmf_forward_kernel(%arg0: memref<16x8xf32, #tpu.memory_space<vmem>>, %arg1: memref<8x32xf32, #tpu.memory_space<vmem>>, %arg2: memref<16x8xf32, #tpu.memory_space<vmem>>, %arg3: memref<8x32xf32, #tpu.memory_space<vmem>>) attributes {dimension_semantics = [], scalar_prefetch = 0 : i64, scratch_operands = 0 : i64, tpu.core_type = #tpu.core_type<tc>} {
    %c0 = arith.constant 0 : index
    %c0_0 = arith.constant 0 : index
    %0 = vector.load %arg0[%c0, %c0_0] : memref<16x8xf32, #tpu.memory_space<vmem>>, vector<16x8xf32>
    %c0_1 = arith.constant 0 : index
    %c0_2 = arith.constant 0 : index
    %1 = vector.load %arg2[%c0_1, %c0_2] : memref<16x8xf32, #tpu.memory_space<vmem>>, vector<16x8xf32>
    tpu.vector_store %arg2[%c0_1, %c0_2], %0 {strides = array<i32>} : memref<16x8xf32, #tpu.memory_space<vmem>>, vector<16x8xf32>,
    %c0_3 = arith.constant 0 : index
    %c0_4 = arith.constant 0 : index
    %2 = vector.load %arg1[%c0_3, %c0_4] : memref<8x32xf32, #tpu.memory_space<vmem>>, vector<8x32xf32>
    %c0_5 = arith.constant 0 : index
    %c0_6 = arith.constant 0 : index
    %3 = vector.load %arg3[%c0_5, %c0_6] : memref<8x32xf32, #tpu.memory_space<vmem>>, vector<8x32xf32>
    tpu.vector_store %arg3[%c0_5, %c0_6], %2 {strides = array<i32>} : memref<8x32xf32, #tpu.memory_space<vmem>>, vector<8x32xf32>,
    return
  }
}

</mosaic_0001>

<bundles_post_ra>
// kernel: tpu_custom_call.1
= control target key start
LH: loop header
LB: loop body
LE: loop exit
PB: predicated region body
PF: predicated region fallthrough
CT: control target
= control target key end

     0   :  { %vm20_vm0 = vcmask 261120   ;;  %vm16_vm1 = vcmask 64512   ;;  %s113_s0 = inlined_call_operand.vmem [shape: f32[16,8], index: 0, kind: input, shape index: {}]   ;;  %s114_s1 = inlined_call_operand.vmem [shape: f32[8,32], index: 1, kind: input, shape index: {}]   ;;  %s115_s2 = inlined_call_operand.vmem [shape: f32[16,8], index: 2, kind: output, shape index: {0}]   ;;  %s116_s3 = inlined_call_operand.hbm [shape: f32[8,32], index: 3, kind: output, shape index: {1}]  }
   0x1   :  { %v19_v0 = vld [vmem:[%s114_s1] sm:$0xff]  ;;  %v15_v2 = vld [vmem:[%s113_s0 + $0x8] sm:$0xff] }
   0x2   :  { %v14_v1 = vld [vmem:[%s113_s0] sm:$0xff]  ;;  %21 = vst.msk [vmem:[#allocation2] sm:$0xff] %vm20_vm0, %v19_v0 }
   0x3   :  { %17 = vst.msk [vmem:[%s115_s2] sm:$0xff] %vm16_vm1, %v14_v1  ;;  %18 = vst.msk [vmem:[%s115_s2 + $0x8] sm:$0xff] %vm16_vm1, %v15_v2 }
   0x4   :  { %9 = vsyncpa [#allocation3], 0  ;;  %s65_s1 = smov [#allocation2]  }
   0x5   :  { %s30_s22 = sshll.u32 %s65_s1, 4  ;;  %s31_s22 = int_to_ptr.vmem [resolvable:$true] %s30_s22 }
   0x6   :  { %s41_s23 = scalar_lea.vmem %s31_s22, 128  ;;  %p46_p1 = scmp.lt.s32.totalorder %s31_s22, %s31_s22 }
   0x7   :  { %p42_p0 = scmp.ne.s32.totalorder %s31_s22, %s41_s23  ;;  %p47_p2 = scmp.lt.s32.totalorder %s41_s23, %s41_s23 }
   0x9   :  { %p48_p3 = por %p47_p2, %p46_p1 }
   0xb   :  { %p49_p4 = pnand %p48_p3, %p42_p0 }
   0xd   :  { %52 = shalt.err (!%p49_p4)
}
   0xe   :  { %s53_s25 = scalar_lea.hbm %s116_s3, 128 }
   0xf   :  { %p54_p5 = scmp.ne.s32.totalorder %s116_s3, %s53_s25  ;;  %p57_p6 = scmp.lt.u32.totalorder %s53_s25, %s116_s3 }
  0x11   :  { %p59_p7 = pnand %p57_p6, %p54_p5 }
  0x13   :  { %62 = shalt.err (!%p59_p7)
}
  0x14   :  { %33 = dma.vmem_to_hbm [thread:$0]  %s31_s22, 128, %s116_s3, [#allocation3]  }
  0x15   :  { %63 = dma.done.wait [#allocation3], 128  }
  0x16   :  { %64 = vsyncadd [#allocation3], 4294967168 }
  0x17   :  { %39 = vsyncpa [#allocation3], 1 }

</bundles_post_ra>
